<compile_context>
chip_gen: v7x
topology: tpu7x:2x2x1
jax: 0.10.0
libtpu: 0.0.40
codegen_flags: <defaults>
</compile_context>

<pallas_src>
import functools
import math

import jax
import jax.numpy as jnp
from jax.experimental import pallas as pl
from jax.experimental.pallas import tpu as pltpu


def _round_up(x, m):
    return ((x + m - 1) // m) * m


def _pe_row(seq_len, num_hiddens):
    """Row `seq_len` of the spec's PE table (both even and odd slots use sin)."""
    div_term = jnp.exp(
        jnp.arange(0, num_hiddens, 2, dtype=jnp.float32)
        * (-(math.log(10000.0) / num_hiddens)))                        # (ceil(H/2),)
    sv = jnp.sin(jnp.float32(seq_len) * div_term)
    # Interleave so both even and odd columns carry sin (per the spec's quirk).
    return jnp.stack([sv, sv], axis=-1).reshape(-1)[:num_hiddens]      # (H,)


def _pos_enc_kernel(seed_ref, x_ref, pe_ref, o_ref, *, p, tm, lane_w):
    # x_ref: (tm, W)   pe_ref: (1, W)   o_ref: (tm, W)
    y = x_ref[...] + pe_ref[...]                      # broadcast PE row over tm rows
    if p > 0.0:
        # Counter-based inverted dropout: h = hash(seed, global linear index) in
        # uint32; drop iff h < p * 2^32 (pure integer compare, no float path).
        rows = jax.lax.broadcasted_iota(jnp.int32, y.shape, 0).astype(jnp.uint32)
        cols = jax.lax.broadcasted_iota(jnp.int32, y.shape, 1).astype(jnp.uint32)
        row0 = (pl.program_id(0) * tm).astype(jnp.uint32)
        idx = (row0 + rows) * jnp.uint32(lane_w) + cols
        h = idx + seed_ref[0].astype(jnp.uint32) * jnp.uint32(0x9E3779B9)
        h = h ^ (h >> 16)
        h = h * jnp.uint32(0x7FEB352D)
        h = h ^ (h >> 15)
        h = h * jnp.uint32(0x846CA68B)
        h = h ^ (h >> 16)
        thr = min(int(round(p * 4294967296.0)), 4294967295)
        keep = h >= jnp.uint32(thr)
        y = jnp.where(keep, y * (1.0 / (1.0 - p)), jnp.zeros_like(y))
    o_ref[...] = y.astype(o_ref.dtype)


@functools.partial(jax.jit, static_argnames=("p", "max_len", "block_bytes"))
def positional_encoding(x, seed, *, p=0.0, max_len=5000, block_bytes=4 * 1024 * 1024):
    """out = dropout(x + pm[x.shape[1]], p)  -- faithful to the PyTorch forward."""
    B, S, H = x.shape
    if S >= max_len:
        raise ValueError(f"seq_len {S} must be < max_len {max_len} (spec indexes pm[:, seq_len])")
    pe_row = _pe_row(S, H).astype(x.dtype)            # only row S, no full table

    itemsize = x.dtype.itemsize
    sublane = max(8, 32 // itemsize)                  # 8 for f32, 16 for bf16
    M = B * S

    # Fold k rows into the lane dim when H is not a multiple of 128 so output stores
    # stay unmasked (legal here because the SAME PE row is added to every row).
    k = 1
    if H % 128 != 0:
        for cand in range(2, 129):
            if M % cand == 0 and (cand * H) % 128 == 0:
                k = cand
                break
    W = k * H
    rows = M // k
    x2d = x.reshape(rows, W)                          # pure reshape, no copy
    pe2d = jnp.tile(pe_row, k).reshape(1, W)

    # Row tile sized against a VMEM block budget; double-buffered in+out = 4 blocks
    # (<= ~16 MiB) -> fits v7x's 64 MiB VMEM with headroom and saturates HBM on all gens.
    tm = max(sublane, (block_bytes // max(1, W * itemsize)) // sublane * sublane)
    tm = min(tm, _round_up(rows, sublane))
    grid = pl.cdiv(rows, tm)                          # partial last tile handled by Pallas

    kernel = functools.partial(_pos_enc_kernel, p=float(p), tm=tm, lane_w=W)

    out2d = pl.pallas_call(
        kernel,
        out_shape=jax.ShapeDtypeStruct((rows, W), x.dtype),
        grid_spec=pltpu.PrefetchScalarGridSpec(
            num_scalar_prefetch=1,                    # dropout seed -> SMEM
            grid=(grid,),
            in_specs=[
                pl.BlockSpec((tm, W), lambda i, seed_ref: (i, 0)),    # x row tile
                pl.BlockSpec((1, W), lambda i, seed_ref: (0, 0)),     # grid-invariant PE row
            ],
            out_specs=pl.BlockSpec((tm, W), lambda i, seed_ref: (i, 0)),
        ),
        compiler_params=pltpu.CompilerParams(
            # Row axis is independent work; "parallel" lets it shard across v7x's TCs.
            # TODO(synk): verify in xprof both TensorCores engage on v7x; else CORE_PARALLEL.
            dimension_semantics=("parallel",),
            # 4 pipelined blocks + tiny PE row fit well under 32 MiB on every generation
            # (v5e/v6e 128 MiB physical, v7x 64 MiB); v6e could raise this further.
            vmem_limit_bytes=32 * 1024 * 1024,
        ),
        cost_estimate=pl.CostEstimate(
            flops=2 * M * H,
            transcendentals=0,
            bytes_accessed=(2 * M * H + H) * itemsize,
        ),
    )(seed, x2d, pe2d)

    return out2d.reshape(B, S, H)


# ----------------------------- pure-JAX reference -----------------------------
def _build_pe_table(max_len, num_hiddens):
    """Replicates PositionalEncoding.__init__ (both even and odd slots use sin)."""
    position = jnp.arange(max_len, dtype=jnp.float32)[:, None]
    div_term = jnp.exp(jnp.arange(0, num_hiddens, 2, dtype=jnp.float32)
                       * (-(math.log(10000.0) / num_hiddens)))
    angles = position * div_term
    pm = jnp.zeros((max_len, num_hiddens), jnp.float32)
    pm = pm.at[:, 0::2].set(jnp.sin(angles))
    pm = pm.at[:, 1::2].set(jnp.sin(angles))
    return pm


def _reference(x, max_len=5000):
    B, S, H = x.shape
    pm = _build_pe_table(max_len, H)
    return x + pm[S][None, None, :]


if __name__ == "__main__":
    # Small shapes consistent with the module's forward: (batch, seq, hidden).
    B, S, H = 2, 8, 128
    key = jax.random.PRNGKey(0)
    x = jax.random.normal(key, (B, S, H), dtype=jnp.float32)
    seed = jnp.array([0], dtype=jnp.int32)

    # 1) p = 0 (eval-mode dropout): must match the pure-JAX reference exactly.
    out = positional_encoding(x, seed, p=0.0)
    jax.block_until_ready(out)
    ref = _reference(x)
    assert out.shape == (B, S, H)
    assert jnp.allclose(out, ref, atol=1e-6, rtol=1e-6)

    # 2) p = 0.5 (training-mode dropout): every element is either 0 or (x+pe)/(1-p),
    #    and the keep fraction is statistically sane.
    p = 0.5
    out_d = positional_encoding(x, seed, p=p)
    jax.block_until_ready(out_d)
    scaled = ref / (1.0 - p)
    is_zero = jnp.isclose(out_d, 0.0, atol=1e-6)
    is_scaled = jnp.isclose(out_d, scaled, atol=1e-5, rtol=1e-5)
    assert bool(jnp.all(is_zero | is_scaled))
    keep_frac = float(jnp.mean(is_scaled.astype(jnp.float32)))
    assert 0.25 < keep_frac < 0.75

    # 3) H not a multiple of 128 exercises the lane-folding path.
    x64 = jax.random.normal(jax.random.PRNGKey(1), (2, 8, 64), dtype=jnp.float32)
    out64 = positional_encoding(x64, seed, p=0.0)
    jax.block_until_ready(out64)
    assert out64.shape == (2, 8, 64)
    assert jnp.allclose(out64, _reference(x64), atol=1e-6, rtol=1e-6)

    print("KERNEL_OK")
</pallas_src>

<mosaic_0001>
module attributes {stable_mosaic.version = 11 : i64} {
  func.func @_pos_enc_kernel(%arg0: i32, %arg1: memref<1xi32, #tpu.memory_space<smem>>, %arg2: memref<16x128xf32, #tpu.memory_space<vmem>>, %arg3: memref<1x128xf32, #tpu.memory_space<vmem>>, %arg4: memref<16x128xf32, #tpu.memory_space<vmem>>) attributes {dimension_semantics = [#tpu.dimension_semantics<parallel>], iteration_bounds = array<i64: 1>, scalar_prefetch = 1 : i64, scratch_operands = 0 : i64, tpu.core_type = #tpu.core_type<tc>, window_params = [{transform_indices = @transform_0, window_bounds = array<i64: 16, 128>}, {pipeline_mode = #tpu.pipeline_mode<synchronous>, transform_indices = @transform_1, window_bounds = array<i64: 1, 128>}, {transform_indices = @transform_2, window_bounds = array<i64: 16, 128>}]} {
    %c0 = arith.constant 0 : index
    %c0_0 = arith.constant 0 : index
    %0 = vector.load %arg2[%c0, %c0_0] : memref<16x128xf32, #tpu.memory_space<vmem>>, vector<16x128xf32>
    %c0_1 = arith.constant 0 : index
    %c0_2 = arith.constant 0 : index
    %1 = vector.load %arg3[%c0_1, %c0_2] : memref<1x128xf32, #tpu.memory_space<vmem>>, vector<1x128xf32>
    %2 = vector.broadcast %1 : vector<1x128xf32> to vector<16x128xf32>
    %3 = arith.addf %0, %2 : vector<16x128xf32>
    %c0_3 = arith.constant 0 : index
    %c0_4 = arith.constant 0 : index
    %4 = vector.load %arg4[%c0_3, %c0_4] : memref<16x128xf32, #tpu.memory_space<vmem>>, vector<16x128xf32>
    tpu.vector_store %arg4[%c0_3, %c0_4], %3 {strides = array<i32>} : memref<16x128xf32, #tpu.memory_space<vmem>>, vector<16x128xf32>,
    return
  }
  func.func @transform_0(%arg0: i32, %arg1: memref<1xi32, #tpu.memory_space<smem>>) -> (i32, i32) {
    %c0_i32 = arith.constant 0 : i32
    %c0_i32_0 = arith.constant 0 : i32
    return %arg0, %c0_i32 : i32, i32
  }
  func.func @transform_1(%arg0: i32, %arg1: memref<1xi32, #tpu.memory_space<smem>>) -> (i32, i32) {
    %c0_i32 = arith.constant 0 : i32
    %c0_i32_0 = arith.constant 0 : i32
    %c0_i32_1 = arith.constant 0 : i32
    return %c0_i32, %c0_i32_0 : i32, i32
  }
  func.func @transform_2(%arg0: i32, %arg1: memref<1xi32, #tpu.memory_space<smem>>) -> (i32, i32) {
    %c0_i32 = arith.constant 0 : i32
    %c0_i32_0 = arith.constant 0 : i32
    return %arg0, %c0_i32 : i32, i32
  }
}

</mosaic_0001>

<bundles_post_ra>
// kernel: positional_encoding.1
= control target key start
LH: loop header
LB: loop body
LE: loop exit
PB: predicated region body
PF: predicated region fallthrough
CT: control target
= control target key end

     0   :  { %s115_s0 = inlined_call_operand.<no memory space> [shape: s32[1], index: 0, kind: input, shape index: {}]   ;;  %s116_s1 = inlined_call_operand.vmem [shape: f32[16,128], index: 1, kind: input, shape index: {}]   ;;  %s117_s2 = inlined_call_operand.vmem [shape: f32[1,128], index: 2, kind: input, shape index: {}]   ;;  %s118_s3 = inlined_call_operand.hbm [shape: f32[16,128], index: 3, kind: output, shape index: {}]  }
   0x1   :  { %v14_v0 = vld [vmem:[%s116_s1] sm:$0xff]  ;;  %v15_v2 = vld [vmem:[%s116_s1 + $0x8] sm:$0xff] }
   0x2   :  { %v43_v1 = vld [vmem:[%s117_s2] ss:$0 sm:$0xff] }
   0x3   :  { %v23_v3 = vadd.f32 %v43_v1, %v14_v0  ;;  %v24_v4 = vadd.f32 %v43_v1, %v15_v2 }
   0x4   :  { %9 = vsyncpa [#allocation5], 0  ;;  %s71_s0 = smov [#allocation4]  }
   0x5   :  { %s32_s18 = sshll.u32 %s71_s0, 4  ;;  %25 = vst [vmem:[#allocation4] sm:$0xff] %v23_v3  ;;  %26 = vst [vmem:[#allocation4 + $0x8] sm:$0xff] %v24_v4  ;;  %s33_s18 = int_to_ptr.vmem [resolvable:$true] %s32_s18 }
   0x6   :  { %s47_s19 = scalar_lea.vmem %s33_s18, 256  ;;  %p52_p1 = scmp.lt.s32.totalorder %s33_s18, %s33_s18 }
   0x7   :  { %p48_p0 = scmp.ne.s32.totalorder %s33_s18, %s47_s19  ;;  %p53_p2 = scmp.lt.s32.totalorder %s47_s19, %s47_s19 }
   0x9   :  { %p54_p3 = por %p53_p2, %p52_p1 }
   0xb   :  { %p55_p4 = pnand %p54_p3, %p48_p0 }
   0xd   :  { %58 = shalt.err (!%p55_p4)
}
   0xe   :  { %s59_s21 = scalar_lea.hbm %s118_s3, 256 }
   0xf   :  { %p60_p5 = scmp.ne.s32.totalorder %s118_s3, %s59_s21  ;;  %p63_p6 = scmp.lt.u32.totalorder %s59_s21, %s118_s3 }
  0x11   :  { %p65_p7 = pnand %p63_p6, %p60_p5 }
  0x13   :  { %68 = shalt.err (!%p65_p7)
}
  0x14   :  { %s72_s25 = smov 128   ;;  %s73_s26 = smov 8  }
  0x15   :  { %38 = dma.vmem_to_hbm [thread:$0]  %s33_s18, 256, %s118_s3, [#allocation5], %s72_s25, %s72_s25, %s73_s26  }
  0x16   :  { %69 = dma.done.wait [#allocation5], 256  }
  0x17   :  { %70 = vsyncadd [#allocation5], 4294967040 }
  0x18   :  { %42 = vsyncpa [#allocation5], 1 }

</bundles_post_ra>
